<compile_context>
chip_gen: v5e
topology: v5e:2x2
jax: 0.10.0
libtpu: 0.0.40
codegen_flags: <defaults>
</compile_context>

<pallas_src>
import functools

import jax
import jax.numpy as jnp
from jax.experimental import pallas as pl
from jax.experimental.pallas import tpu as pltpu


# ---------------------------------------------------------------------------
# Shared conv tile: K taps folded into a single MXU contraction.
# ---------------------------------------------------------------------------
def _conv_tile(x, w, *, K, dilation, L_out):
    """x: (Bn, L_pad, C_in) compute dtype, w: (K*C_in, C_PAD) compute dtype.

    Returns f32 (Bn, L_out, C_PAD)."""
    Bn, _, C_in = x.shape
    C_PAD = w.shape[-1]

    if K == 1:
        cols = x[:, :L_out, :]
    else:
        # im2col over K only: concat shifted slices along the lane (channel) axis.
        cols = jnp.concatenate(
            [x[:, k * dilation: k * dilation + L_out, :] for k in range(K)],
            axis=-1)                                         # (Bn, L_out, K*C_in)

    if L_out % 16 == 0:
        # Flat 2D matmul: one large sublane-dense MXU op (preferred path).
        lhs = cols.reshape(Bn * L_out, K * C_in)
        acc = jnp.dot(lhs, w, preferred_element_type=jnp.float32)
        return acc.reshape(Bn, L_out, C_PAD)

    # Fallback (unaligned L_out): still a single matmul over the K*C_in axis.
    return jax.lax.dot_general(cols, w, (((2,), (0,)), ((), ())),
                               preferred_element_type=jnp.float32)


# ---------------------------------------------------------------------------
# Pass 1: conv tile + per-tile per-channel sum / sum-of-squares partials.
# ---------------------------------------------------------------------------
def _conv_stats_kernel(x_ref, w_ref, stats_ref, *, K, dilation, L_out,
                       compute_dtype, n_total, block_n, mask_rows):
    acc = _conv_tile(x_ref[...].astype(compute_dtype), w_ref[...],
                     K=K, dilation=dilation, L_out=L_out)    # (Bn, L_out, C_PAD) f32
    if mask_rows:
        # Ragged last tile: zero rows past the true batch size so the GLOBAL
        # BN statistics stay exact (per-tile BN would be silently wrong).
        b0 = pl.program_id(0) * block_n
        bid = b0 + jax.lax.broadcasted_iota(jnp.int32, acc.shape, 0)
        acc = jnp.where(bid < n_total, acc, 0.0)
    stats_ref[:, 0:1, :] = jnp.sum(acc, axis=(0, 1), keepdims=True)
    stats_ref[:, 1:2, :] = jnp.sum(acc * acc, axis=(0, 1), keepdims=True)


# ---------------------------------------------------------------------------
# Pass 2: recompute conv tile, apply folded BN affine (scale/shift) + ReLU.
# ---------------------------------------------------------------------------
def _conv_bn_relu_kernel(x_ref, w_ref, affine_ref, o_ref, *, K, dilation, L_out,
                         compute_dtype):
    acc = _conv_tile(x_ref[...].astype(compute_dtype), w_ref[...],
                     K=K, dilation=dilation, L_out=L_out)    # (Bn, L_out, C_PAD) f32
    C_PAD = o_ref.shape[-1]
    scale = affine_ref[0:1, :].reshape(1, 1, C_PAD)
    shift = affine_ref[1:2, :].reshape(1, 1, C_PAD)
    y = acc * scale + shift
    o_ref[...] = jnp.maximum(y, 0.0).astype(o_ref.dtype)


# ---------------------------------------------------------------------------
# Wrappers
# ---------------------------------------------------------------------------
def basic_conv_nlc(x_nlc, weight, gamma, beta, *, stride=1, padding=0,
                   dilation=1, eps=1e-5, compute_dtype=jnp.bfloat16,
                   block_n=None):
    """BasicConv forward on channel-last input.

    x_nlc:  (N, L, C_in)
    weight: (C_out, C_in, K)   PyTorch Conv1d weight layout
    gamma, beta: (C_out,)      BatchNorm1d affine
    returns (N, L_out, C_out)
    """
    if stride != 1:
        # TODO(synk): strided Conv1d not needed for BasicConv defaults.
        raise NotImplementedError("only stride=1 supported")

    N, L, C_in = x_nlc.shape
    C_out, C_in_w, K = weight.shape
    if C_in_w != C_in:
        # TODO(synk): grouped conv not needed for BasicConv defaults.
        raise NotImplementedError("only groups=1 supported")

    L_pad = L + 2 * padding
    L_out = (L_pad - dilation * (K - 1) - 1) // stride + 1
    C_PAD = ((C_out + 127) // 128) * 128            # lane-dense output channels

    # TODO(synk): fuse spatial zero-padding into the kernel as boundary masking
    # to avoid this extra HBM pass over x when padding > 0.
    x = x_nlc if padding == 0 else jnp.pad(
        x_nlc, ((0, 0), (padding, padding), (0, 0)))

    # (C_out, C_in, K) -> (K*C_in, C_PAD); row order (k, c_in) matches im2col.
    w = jnp.transpose(weight, (2, 1, 0)).reshape(K * C_in, C_out)
    w = jnp.pad(w, ((0, 0), (0, C_PAD - C_out))).astype(compute_dtype)

    # --- batch-axis tiling ------------------------------------------------
    if block_n is None:
        block_n = max(1, 512 // max(L_out, 1))      # ~512 output rows / tile
    block_n = max(1, min(block_n, N))
    num_tiles = pl.cdiv(N, block_n)
    mask_rows = (num_tiles * block_n != N)

    # Tiles are ~1 MiB incl. double buffers -> comfortably inside v7x's 64 MiB
    # physical VMEM; state the scoped limit explicitly.
    compiler_params = pltpu.CompilerParams(
        dimension_semantics=("parallel",),
        vmem_limit_bytes=32 * 1024 * 1024,
    )
    # TODO(synk): consider pipeline_mode=pl.Buffered(3) on x_spec if DMA is exposed.
    x_spec = pl.BlockSpec((block_n, L_pad, C_in), lambda i: (i, 0, 0))
    w_spec = pl.BlockSpec((K * C_in, C_PAD), lambda i: (0, 0))

    conv_flops = 2 * N * L_out * K * C_in * C_PAD
    x_bytes = int(x.size) * x.dtype.itemsize
    w_bytes = int(w.size) * 2

    # ---- pass 1: conv + per-tile stats ------------------------------------
    stats = pl.pallas_call(
        functools.partial(_conv_stats_kernel, K=K, dilation=dilation,
                          L_out=L_out, compute_dtype=compute_dtype,
                          n_total=N, block_n=block_n, mask_rows=mask_rows),
        grid=(num_tiles,),
        in_specs=[x_spec, w_spec],
        out_specs=pl.BlockSpec((1, 2, C_PAD), lambda i: (i, 0, 0)),
        out_shape=jax.ShapeDtypeStruct((num_tiles, 2, C_PAD), jnp.float32),
        compiler_params=compiler_params,
        cost_estimate=pl.CostEstimate(
            flops=conv_flops + 3 * N * L_out * C_PAD,
            transcendentals=0,
            bytes_accessed=x_bytes + w_bytes + num_tiles * 2 * C_PAD * 4),
    )(x, w)

    # ---- tiny cross-tile reduction + BN affine folding --------------------
    # Training-mode BatchNorm1d: biased batch variance, eps inside rsqrt,
    # affine folded into y = conv * scale + shift.
    cnt = float(N * L_out)
    sums = jnp.sum(stats, axis=0)                            # (2, C_PAD)
    mean = sums[0] / cnt
    var = jnp.maximum(sums[1] / cnt - mean * mean, 0.0)      # clamp (cancellation)
    inv_std = jax.lax.rsqrt(var + eps)
    gamma_p = jnp.pad(gamma.astype(jnp.float32), (0, C_PAD - C_out))
    beta_p = jnp.pad(beta.astype(jnp.float32), (0, C_PAD - C_out))
    scale = gamma_p * inv_std
    shift = beta_p - mean * scale
    affine = jnp.stack([scale, shift], axis=0)               # (2, C_PAD) f32

    # ---- pass 2: conv recompute + scale/shift + ReLU -----------------------
    out_pad = pl.pallas_call(
        functools.partial(_conv_bn_relu_kernel, K=K, dilation=dilation,
                          L_out=L_out, compute_dtype=compute_dtype),
        grid=(num_tiles,),
        in_specs=[x_spec, w_spec, pl.BlockSpec((2, C_PAD), lambda i: (0, 0))],
        out_specs=pl.BlockSpec((block_n, L_out, C_PAD), lambda i: (i, 0, 0)),
        out_shape=jax.ShapeDtypeStruct((N, L_out, C_PAD), x_nlc.dtype),
        compiler_params=compiler_params,
        cost_estimate=pl.CostEstimate(
            flops=conv_flops + 3 * N * L_out * C_PAD,
            transcendentals=0,
            bytes_accessed=(x_bytes + w_bytes + 2 * C_PAD * 4
                            + N * L_out * C_PAD * x_nlc.dtype.itemsize)),
    )(x, w, affine)

    return out_pad[:, :, :C_out]                             # (N, L_out, C_out)


def basic_conv(x_ncl, weight, gamma, beta, **kwargs):
    """PyTorch-layout entry point: (N, C_in, L) in, (N, C_out, L_out) out.

    Channel-last callers should call `basic_conv_nlc` directly and skip the two
    boundary transposes (each is a full HBM round trip).
    """
    x_nlc = jnp.transpose(x_ncl, (0, 2, 1))
    out_nlc = basic_conv_nlc(x_nlc, weight, gamma, beta, **kwargs)
    return jnp.transpose(out_nlc, (0, 2, 1))


# ---------------------------------------------------------------------------
# Pure-JAX reference (lax conv + training-mode BN + ReLU)
# ---------------------------------------------------------------------------
def _reference(x_ncl, weight, gamma, beta, *, padding, dilation, eps=1e-5):
    y = jax.lax.conv_general_dilated(
        x_ncl.astype(jnp.float32), weight.astype(jnp.float32),
        window_strides=(1,), padding=[(padding, padding)],
        rhs_dilation=(dilation,),
        dimension_numbers=("NCH", "OIH", "NCH"),
    )
    mean = jnp.mean(y, axis=(0, 2), keepdims=True)
    var = jnp.mean((y - mean) ** 2, axis=(0, 2), keepdims=True)
    y = (y - mean) * jax.lax.rsqrt(var + eps)
    y = y * gamma.reshape(1, -1, 1) + beta.reshape(1, -1, 1)
    return jnp.maximum(y, 0.0)


if __name__ == "__main__":
    # BasicConv(in_planes=8, out_planes=16, kernel_size=3, padding=1)
    N, C_in, C_out, L, K, PAD = 2, 8, 16, 32, 3, 1

    key = jax.random.PRNGKey(0)
    kx, kw = jax.random.split(key)
    x = jax.random.normal(kx, (N, C_in, L), dtype=jnp.float32)
    weight = jax.random.normal(kw, (C_out, C_in, K), dtype=jnp.float32) * 0.1
    gamma = jnp.ones((C_out,), jnp.float32)   # PyTorch BN default affine init
    beta = jnp.zeros((C_out,), jnp.float32)

    ref = _reference(x, weight, gamma, beta, padding=PAD, dilation=1)

    # f32-compute path: tight validation against the f32 reference.
    out_f32 = jax.block_until_ready(
        basic_conv(x, weight, gamma, beta, padding=PAD,
                   compute_dtype=jnp.float32))
    assert out_f32.shape == (N, C_out, L), out_f32.shape
    assert jnp.allclose(out_f32, ref, atol=1e-4, rtol=1e-4), \
        float(jnp.max(jnp.abs(out_f32 - ref)))

    # Default bf16 MXU path (f32 accumulation): looser tolerance.
    out_bf16 = jax.block_until_ready(
        basic_conv(x, weight, gamma, beta, padding=PAD))
    assert out_bf16.shape == (N, C_out, L), out_bf16.shape
    assert jnp.allclose(out_bf16, ref, atol=3e-2, rtol=3e-2), \
        float(jnp.max(jnp.abs(out_bf16 - ref)))

    print("KERNEL_OK")
</pallas_src>

<mosaic_0001>
module attributes {stable_mosaic.version = 11 : i64} {
  func.func @_conv_stats_kernel(%arg0: i32, %arg1: memref<2x34x8xf32, #tpu.memory_space<vmem>>, %arg2: memref<24x128xf32, #tpu.memory_space<vmem>>, %arg3: memref<1x2x128xf32, #tpu.memory_space<vmem>>) attributes {dimension_semantics = [#tpu.dimension_semantics<parallel>], iteration_bounds = array<i64: 1>, scalar_prefetch = 0 : i64, scratch_operands = 0 : i64, tpu.core_type = #tpu.core_type<tc>, window_params = [{transform_indices = @transform_0, window_bounds = array<i64: 2, 34, 8>}, {pipeline_mode = #tpu.pipeline_mode<synchronous>, transform_indices = @transform_1, window_bounds = array<i64: 24, 128>}, {transform_indices = @transform_2, window_bounds = array<i64: 1, 2, 128>}]} {
    %c0 = arith.constant 0 : index
    %c0_0 = arith.constant 0 : index
    %c0_1 = arith.constant 0 : index
    %0 = vector.load %arg1[%c0, %c0_0, %c0_1] : memref<2x34x8xf32, #tpu.memory_space<vmem>>, vector<2x34x8xf32>
    %c0_2 = arith.constant 0 : index
    %c0_3 = arith.constant 0 : index
    %1 = vector.load %arg2[%c0_2, %c0_3] : memref<24x128xf32, #tpu.memory_space<vmem>>, vector<24x128xf32>
    %2 = vector.extract_strided_slice %0 {offsets = [0, 0, 0], sizes = [2, 32, 8], strides = [1, 1, 1]} : vector<2x34x8xf32> to vector<2x32x8xf32>
    %3 = vector.extract_strided_slice %0 {offsets = [0, 1, 0], sizes = [2, 32, 8], strides = [1, 1, 1]} : vector<2x34x8xf32> to vector<2x32x8xf32>
    %4 = vector.extract_strided_slice %0 {offsets = [0, 2, 0], sizes = [2, 32, 8], strides = [1, 1, 1]} : vector<2x34x8xf32> to vector<2x32x8xf32>
    %5 = tpu.concatenate %2, %3, %4 in 2 : vector<2x32x8xf32>, vector<2x32x8xf32>, vector<2x32x8xf32> -> vector<2x32x24xf32>
    %6 = vector.shape_cast %5 : vector<2x32x24xf32> to vector<64x24xf32>
    %cst = arith.constant dense<0.000000e+00> : vector<64x128xf32>
    %7 = tpu.matmul %6, %1, %cst {dimension_numbers = #tpu.dot_dimension_numbers<[1], [0], [0], [1], [0, 0, 1, 1], [], []>} : vector<64x24xf32>, vector<24x128xf32>, vector<64x128xf32> -> vector<64x128xf32>
    %8 = vector.shape_cast %7 : vector<64x128xf32> to vector<2x32x128xf32>
    %cst_4 = arith.constant dense<0.000000e+00> : vector<128xf32>
    %9 = vector.multi_reduction <add>, %8, %cst_4 [0, 1] : vector<2x32x128xf32> to vector<128xf32>
    %10 = vector.shape_cast %9 : vector<128xf32> to vector<1x1x128xf32>
    %c0_5 = arith.constant 0 : index
    %c0_6 = arith.constant 0 : index
    %c0_7 = arith.constant 0 : index
    %11 = vector.load %arg3[%c0_5, %c0_6, %c0_7] : memref<1x2x128xf32, #tpu.memory_space<vmem>>, vector<1x1x128xf32>
    tpu.vector_store %arg3[%c0_5, %c0_6, %c0_7], %10 {strides = array<i32>} : memref<1x2x128xf32, #tpu.memory_space<vmem>>, vector<1x1x128xf32>,
    %12 = arith.mulf %8, %8 : vector<2x32x128xf32>
    %cst_8 = arith.constant dense<0.000000e+00> : vector<128xf32>
    %13 = vector.multi_reduction <add>, %12, %cst_8 [0, 1] : vector<2x32x128xf32> to vector<128xf32>
    %14 = vector.shape_cast %13 : vector<128xf32> to vector<1x1x128xf32>
    %c0_9 = arith.constant 0 : index
    %c1 = arith.constant 1 : index
    %c0_10 = arith.constant 0 : index
    %15 = vector.load %arg3[%c0_9, %c1, %c0_10] : memref<1x2x128xf32, #tpu.memory_space<vmem>>, vector<1x1x128xf32>
    tpu.vector_store %arg3[%c0_9, %c1, %c0_10], %14 {strides = array<i32>} : memref<1x2x128xf32, #tpu.memory_space<vmem>>, vector<1x1x128xf32>,
    return
  }
  func.func @transform_0(%arg0: i32) -> (i32, i32, i32) {
    %c0_i32 = arith.constant 0 : i32
    %c0_i32_0 = arith.constant 0 : i32
    %c0_i32_1 = arith.constant 0 : i32
    return %arg0, %c0_i32, %c0_i32_0 : i32, i32, i32
  }
  func.func @transform_1(%arg0: i32) -> (i32, i32) {
    %c0_i32 = arith.constant 0 : i32
    %c0_i32_0 = arith.constant 0 : i32
    %c0_i32_1 = arith.constant 0 : i32
    return %c0_i32, %c0_i32_0 : i32, i32
  }
  func.func @transform_2(%arg0: i32) -> (i32, i32, i32) {
    %c0_i32 = arith.constant 0 : i32
    %c0_i32_0 = arith.constant 0 : i32
    %c0_i32_1 = arith.constant 0 : i32
    return %arg0, %c0_i32, %c0_i32_0 : i32, i32, i32
  }
}

</mosaic_0001>

<bundles_post_ra>
// kernel: tpu_custom_call.1
= control target key start
LH: loop header
LB: loop body
LE: loop exit
PB: predicated region body
PF: predicated region fallthrough
CT: control target
= control target key end

     0   :  { %vm35_vm0 = vcmask 1046528   ;;  %s303_s21 = smov 8   ;;  %s459_s0 = inlined_call_operand.vmem [shape: f32[2,34,8], index: 0, kind: input, shape index: {}]   ;;  %s460_s1 = inlined_call_operand.vmem [shape: f32[24,128], index: 1, kind: input, shape index: {}]   ;;  %s461_s2 = inlined_call_operand.hbm [shape: f32[1,2,128], index: 2, kind: output, shape index: {}]  }
   0x1   :  { %v324_v0 = vld [vmem:[%s459_s0 + $0x28] sm:$0xff]  ;;  %v329_v1 = vld [vmem:[%s459_s0 + $0x30] sm:$0xff]  ;;  %v334_v2 = vld [vmem:[%s459_s0] sm:$0xff] }
   0x2   :  { %v45_v3 = vrot.slane %v324_v0, 1  ;;  %v46_v4 = vrot.slane %v329_v1, 1  ;;  %v341_v5 = vld [vmem:[%s459_s0 + $0x8] sm:$0xff]  ;;  %v36_v6 = vrot.slane %v334_v2, 1  ;;  %v349_v9 = vld [vmem:[%s459_s0 + $0x10] sm:$0xff]  ;;  %v354_v10 = vld [vmem:[%s459_s0 + $0x18] sm:$0xff] }
   0x3   :  { %v37_v7 = vrot.slane %v341_v5, 1 }
   0x4   :  { %v47_v8 = vsel %vm35_vm0, %v45_v3, %v46_v4 }
   0x5   :  { %62 = vrot.lane.b32.xlu1 %v47_v8, %s303_s21  ;;  %v38_v11 = vsel %vm35_vm0, %v36_v6, %v37_v7 }
   0x6   :  { %7 = vsyncpa [#allocation3], 0  ;;  %54 = vrot.lane.b32.xlu0 %v38_v11, %s303_s21  ;;  %v88_v12 = vrot.slane %v324_v0, 2  ;;  %v89_v13 = vrot.slane %v329_v1, 2  ;;  %v39_v14 = vrot.slane %v349_v9, 1  ;;  %v41_v15 = vrot.slane %v354_v10, 1 }
   0x7   :  { %vm78_vm1 = vcmask 1045504   ;;  %v79_v16 = vrot.slane %v334_v2, 2  ;;  %v80_v17 = vrot.slane %v341_v5, 2  ;;  %v84_v20 = vrot.slane %v354_v10, 2  ;;  %v373_v22 = vld [vmem:[%s459_s0 + $0x38] sm:$0xff]  ;;  %v378_v23 = vld [vmem:[%s459_s0 + $0x40] sm:$0xff] }
   0x8   :  { %v42_v18 = vsel %vm35_vm0, %v39_v14, %v41_v15  ;;  %v90_v19 = vsel %vm78_vm1, %v88_v12, %v89_v13  ;;  %v82_v24 = vrot.slane %v349_v9, 2  ;;  %s304_s26 = smov 16   ;;  %v91_v25 = vrot.slane %v373_v22, 2  ;;  %v16_v35 = vld [vmem:[%s459_s0 + $0x20] sm:$0x3]  ;;  %v24_v46 = vld [vmem:[%s460_s1 + $0x10] sm:$0xff] }
   0x9   :  { %58 = vrot.lane.b32.xlu2 %v42_v18, %s303_s21  ;;  %v81_v21 = vsel %vm78_vm1, %v79_v16, %v80_v17  ;;  %v93_v26 = vrot.slane %v378_v23, 2  ;;  %v48_v28 = vrot.slane %v373_v22, 1  ;;  %v50_v29 = vrot.slane %v378_v23, 1  ;;  %v21_v39 = vld [vmem:[%s459_s0 + $0x48] sm:$0x3]  ;;  %177 = vmatpush.msra.mxu0 %v24_v46  ;;  %v22_v48 = vld [vmem:[%s460_s1] sm:$0xff] }
   0xa   :  { %v85_v27 = vsel %vm78_vm1, %v82_v24, %v84_v20  ;;  %v40_v32 = vsel %vm35_vm0, %v37_v7, %v39_v14  ;;  %v83_v34 = vsel %vm78_vm1, %v80_v17, %v82_v24  ;;  %v86_v36 = vrot.slane %v16_v35, 2  ;;  %v23_v47 = vld [vmem:[%s460_s1 + $0x8] sm:$0xff]  ;;  %265 = vmatpush.msra.mxu1 %v24_v46  ;;  %266 = vmatpush.msra.mxu2 %v24_v46  ;;  %s305_s1 = smov [#allocation2]   ;;  %s248_s11 = sshll.u32 %s461_s2, 4  ;;  %s249_s11 = int_to_ptr.hbm [resolvable:$true] %s248_s11 }
   0xb   :  { %v94_v30 = vsel %vm78_vm1, %v91_v25, %v93_v26  ;;  %v51_v31 = vsel %vm35_vm0, %v48_v28, %v50_v29  ;;  %v49_v33 = vsel %vm35_vm0, %v46_v4, %v48_v28  ;;  %v92_v37 = vsel %vm78_vm1, %v89_v13, %v91_v25  ;;  %267 = vmatpush.msra.mxu3 %v24_v46  ;;  %s246_s8 = sshll.u32 %s305_s1, 4  ;;  %s247_s8 = int_to_ptr.vmem [resolvable:$true] %s246_s8 }
   0xc   :  { %v43_v38 = vrot.slane %v16_v35, 1  ;;  %v87_v40 = vsel %vm78_vm1, %v84_v20, %v86_v36  ;;  %v52_v41 = vrot.slane %v21_v39, 1  ;;  %v95_v44 = vrot.slane %v21_v39, 2  ;;  %178 = vmatpush.msra.mxu0 %v23_v47  ;;  %268 = vmatpush.msra.mxu1 %v23_v47 }
   0xd   :  { %105 = vrot.lane.b32.xlu1 %v90_v19, %s304_s26  ;;  %269 = vmatpush.msra.mxu2 %v23_v47  ;;  %vm121_vm2 = vcmask 64512   ;;  %vm130_vm3 = vcmask 130048   ;;  %vm139_vm4 = vcmask 195584  }
   0xe   :  { %97 = vrot.lane.b32.xlu0 %v81_v21, %s304_s26  ;;  %v44_v42 = vsel %vm35_vm0, %v41_v15, %v43_v38  ;;  %v53_v43 = vsel %vm35_vm0, %v50_v29, %v52_v41  ;;  %v96_v45 = vsel %vm78_vm1, %v93_v26, %v95_v44  ;;  %270 = vmatpush.msra.mxu3 %v23_v47 }
   0xf   :  { %179 = vmatpush.msra.mxu0 %v22_v48  ;;  %271 = vmatpush.msra.mxu1 %v22_v48 }
  0x10   :  { %272 = vmatpush.msra.mxu2 %v22_v48  ;;  %273 = vmatpush.msra.mxu3 %v22_v48 }
  0x11   :  { %101 = vrot.lane.b32.xlu2 %v85_v27, %s304_s26 }
  0x15   :  { %109 = vrot.lane.b32.xlu1 %v94_v30, %s304_s26 }
  0x16   :  { %66 = vrot.lane.b32.xlu0 %v51_v31, %s303_s21 }
  0x19   :  { %56 = vrot.lane.b32.xlu2 %v40_v32, %s303_s21 }
  0x1d   :  { %64 = vrot.lane.b32.xlu1 %v49_v33, %s303_s21 }
  0x1e   :  { %99 = vrot.lane.b32.xlu0 %v83_v34, %s304_s26 }
  0x21   :  { %107 = vrot.lane.b32.xlu2 %v92_v37, %s304_s26 }
  0x25   :  { %103 = vrot.lane.b32.xlu1 %v87_v40, %s304_s26 }
  0x26   :  { %60 = vrot.lane.b32.xlu0 %v44_v42, %s303_s21 }
  0x29   :  { %68 = vrot.lane.b32.xlu2 %v53_v43, %s303_s21 }
  0x2e   :  { %111 = vrot.lane.b32.xlu0 %v96_v45, %s304_s26 }
  0x63   :  { %v59_v49 = vpop.permute.xlu2 %58 }
  0x64   :  { %v124_v50 = vsel %vm121_vm2, %v349_v9, %v59_v49 }
  0x6b   :  { %v102_v51 = vpop.permute.xlu2 %101 }
  0x6c   :  { %v133_v52 = vsel %vm130_vm3, %v124_v50, %v102_v51 }
  0x6d   :  { %259 = vmatmul.msk.f32.vlgmr.msra.gmra.mxu1 %vm139_vm4, %v133_v52 }
  0x73   :  { %v57_v61 = vpop.permute.xlu2 %56 }
  0x77   :  { %v63_v53 = vpop.permute.xlu1 %62 }
  0x78   :  { %v55_v54 = vpop.permute.xlu0 %54  ;;  %v126_v55 = vsel %vm121_vm2, %v324_v0, %v63_v53 }
  0x79   :  { %v122_v57 = vsel %vm121_vm2, %v334_v2, %v55_v54  ;;  %v123_v2 = vsel %vm121_vm2, %v341_v5, %v57_v61 }
  0x7b   :  { %v108_v4 = vpop.permute.xlu2 %107 }
  0x7f   :  { %v106_v56 = vpop.permute.xlu1 %105 }
  0x80   :  { %v98_v58 = vpop.permute.xlu0 %97  ;;  %v135_v59 = vsel %vm130_vm3, %v126_v55, %v106_v56 }
  0x81   :  { %v131_v60 = vsel %vm130_vm3, %v122_v57, %v98_v58  ;;  %261 = vmatmul.msk.f32.vlgmr.msra.gmra.mxu2 %vm139_vm4, %v135_v59 }
  0x82   :  { %257 = vmatmul.msk.f32.vlgmr.msra.gmra.mxu0 %vm139_vm4, %v131_v60 }
  0x83   :  { %v69_v15 = vpop.permute.xlu2 %68 }
  0x87   :  { %v110_v62 = vpop.permute.xlu1 %109 }
  0x88   :  { %v67_v63 = vpop.permute.xlu0 %66 }
  0x89   :  { %v128_v3 = vsel %vm121_vm2, %v373_v22, %v67_v63 }
  0x8a   :  { %v137_v0 = vsel %vm130_vm3, %v128_v3, %v110_v62 }
  0x8b   :  { %263 = vmatmul.msk.f32.vlgmr.msra.gmra.mxu3 %vm139_vm4, %v137_v0 }
  0x8f   :  { %v65_v6 = vpop.permute.xlu1 %64 }
  0x90   :  { %v100_v7 = vpop.permute.xlu0 %99  ;;  %v127_v8 = vsel %vm121_vm2, %v329_v1, %v65_v6  ;;  %v129_v1 = vsel %vm121_vm2, %v378_v23, %v69_v15 }
  0x91   :  { %v132_v9 = vsel %vm130_vm3, %v123_v2, %v100_v7  ;;  %v136_v11 = vsel %vm130_vm3, %v127_v8, %v108_v4 }
  0x92   :  { %258 = vmatmul.msk.f32.gmra.mxu0 %vm139_vm4, %v132_v9  ;;  %262 = vmatmul.msk.f32.gmra.mxu2 %vm139_vm4, %v136_v11 }
  0x97   :  { %v104_v12 = vpop.permute.xlu1 %103 }
  0x98   :  { %v61_v13 = vpop.permute.xlu0 %60 }
  0x99   :  { %v125_v14 = vsel %vm121_vm2, %v354_v10, %v61_v13 }
  0x9a   :  { %v134_v5 = vsel %vm130_vm3, %v125_v14, %v104_v12 }
  0x9b   :  { %260 = vmatmul.msk.f32.gmra.mxu1 %vm139_vm4, %v134_v5 }
  0xa0   :  { %v112_v16 = vpop.permute.xlu0 %111 }
  0xa1   :  { %v138_v17 = vsel %vm130_vm3, %v129_v1, %v112_v16 }
  0xa2   :  { %264 = vmatmul.msk.f32.gmra.mxu3 %vm139_vm4, %v138_v17 }
  0xea   :  { %v187_v20 = vpop.f32.mrf.mxu1 }
  0xeb   :  { %v221_v26 = vmul.f32 %v187_v20, %v187_v20 }
  0xff   :  { %v181_v18 = vpop.f32.mrf.mxu0 }
 0x100   :  { %v219_v22 = vmul.f32 %v181_v18, %v181_v18 }
 0x104   :  { %v193_v24 = vpop.f32.mrf.mxu2 }
 0x105   :  { %v223_v33 = vmul.f32 %v193_v24, %v193_v24 }
 0x10e   :  { %v199_v35 = vpop.f32.mrf.mxu3 }
 0x10f   :  { %v184_v19 = vpop.f32.mrf.mxu0  ;;  %v225_v40 = vmul.f32 %v199_v35, %v199_v35 }
 0x110   :  { %v220_v21 = vmul.f32 %v184_v19, %v184_v19  ;;  %v205_v10 = vadd.f32 %v184_v19, %v181_v18 }
 0x112   :  { %v227_v25 = vadd.f32 %v220_v21, %v219_v22  ;;  %v206_v27 = vadd.f32 %v205_v10, %v187_v20 }
 0x114   :  { %v228_v31 = vadd.f32 %v227_v25, %v221_v26 }
 0x115   :  { %v196_v32 = vpop.f32.mrf.mxu2 }
 0x116   :  { %v224_v36 = vmul.f32 %v196_v32, %v196_v32 }
 0x118   :  { %v190_v28 = vpop.f32.mrf.mxu1 }
 0x119   :  { %v207_v29 = vadd.f32 %v206_v27, %v190_v28  ;;  %v222_v30 = vmul.f32 %v190_v28, %v190_v28 }
 0x11b   :  { %v229_v23 = vadd.f32 %v228_v31, %v222_v30  ;;  %v208_v34 = vadd.f32 %v207_v29, %v193_v24 }
 0x11d   :  { %v230_v37 = vadd.f32 %v229_v23, %v223_v33  ;;  %v209_v38 = vadd.f32 %v208_v34, %v196_v32 }
 0x11f   :  { %v231_v39 = vadd.f32 %v230_v37, %v224_v36  ;;  %v210_v41 = vadd.f32 %v209_v38, %v199_v35 }
 0x121   :  { %v232_v45 = vadd.f32 %v231_v39, %v225_v40 }
 0x125   :  { %v202_v42 = vpop.f32.mrf.mxu3 }
 0x126   :  { %v211_v43 = vadd.f32 %v210_v41, %v202_v42  ;;  %v226_v44 = vmul.f32 %v202_v42, %v202_v42 }
 0x128   :  { %v212_v46 = vrot.slane %v211_v43, 4  ;;  %v233_v47 = vadd.f32 %v232_v45, %v226_v44 }
 0x12a   :  { %v213_v48 = vadd.f32 %v212_v46, %v211_v43  ;;  %v234_v49 = vrot.slane %v233_v47, 4 }
 0x12c   :  { %v214_v50 = vrot.slane %v213_v48, 2  ;;  %v235_v51 = vadd.f32 %v234_v49, %v233_v47 }
 0x12e   :  { %v215_v52 = vadd.f32 %v214_v50, %v213_v48  ;;  %v236_v53 = vrot.slane %v235_v51, 2 }
 0x130   :  { %v216_v54 = vrot.slane %v215_v52, 1  ;;  %v237_v55 = vadd.f32 %v236_v53, %v235_v51 }
 0x132   :  { %v217_v56 = vadd.f32 %v216_v54, %v215_v52  ;;  %v238_v57 = vrot.slane %v237_v55, 1 }
 0x134   :  { %218 = vst [vmem:[#allocation2] sm:$0x1] %v217_v56  ;;  %v239_v58 = vadd.f32 %v238_v57, %v237_v55 }
 0x136   :  { %240 = vst [vmem:[#allocation2 + $0x1] sm:$0x1] %v239_v58 }
 0x137   :  { %251 = dma.vmem_to_hbm [thread:$0]  %s247_s8, 32, %s249_s11, [#allocation3]  }
 0x138   :  { %301 = dma.done.wait [#allocation3], 32  }
 0x139   :  { %302 = vsyncadd [#allocation3], 4294967264 }
 0x13a   :  { %256 = vsyncpa [#allocation3], 1 }

</bundles_post_ra>
